<compile_context>
chip_gen: v6e
topology: v6e:2x2x1
jax: 0.10.0
libtpu: 0.0.40
codegen_flags: <defaults>
</compile_context>

<pallas_src>
import math
import re

import jax
import jax.numpy as jnp
from jax.experimental import pallas as pl
from jax.experimental.pallas import tpu as pltpu


def _squared_relu_kernel(x_ref, o_ref):
    x = x_ref[...]
    r = jnp.maximum(x, 0)
    # Computed in the input dtype (matches the naive torch module).  Integer
    # inputs would wrap on r*r exactly like torch's `**2`; floats are the
    # intended use of this activation.
    o_ref[...] = r * r


def _tpu_generation():
    """Best-effort TPU generation (5, 6, 7, ...) from the device kind string."""
    try:
        kind = jax.devices()[0].device_kind
    except Exception:
        return None
    m = re.search(r"(\d+)", str(kind))
    return int(m.group(1)) if m else None


def _choose_row_tile(rows, pack, tr_target, prefer_even_blocks):
    """Pick a row-tile height.

    Largest multiple of `pack` not exceeding `tr_target` (or `rows` itself if
    everything fits in one target block).  Prefers a value that divides `rows`
    exactly (identical-cost steps, no masked partial stores) and, when asked,
    one that yields an even block count so v7x's two TensorCores stay balanced.
    """
    if tr_target >= rows:
        return rows
    tr = max(pack, (tr_target // pack) * pack)
    best = None
    best_even = None
    t = tr
    steps = 0
    # Bounded trace-time search; never shrink blocks below half the target.
    while t >= pack and 2 * t >= tr and steps < 1024:
        if rows % t == 0:
            if best is None:
                best = t
            if (rows // t) % 2 == 0:
                best_even = t
                break
        t -= pack
        steps += 1
    if prefer_even_blocks and best_even is not None:
        return best_even
    if best is not None:
        return best
    return tr


def squared_relu(x, *, target_block_bytes=None, donate_input=False):
    """Elementwise relu(x)**2 via a Pallas TPU kernel. Preserves shape/dtype."""
    orig_shape = x.shape
    dtype = x.dtype
    total = math.prod(orig_shape) if orig_shape else 1
    if total == 0:
        # Empty tensor: nothing to compute, avoid an empty grid.
        return x

    itemsize = jnp.dtype(dtype).itemsize
    # Sublane packing per dtype width (f32 -> 8, bf16 -> 16, int8/fp8 -> 32).
    pack = {4: 8, 2: 16, 1: 32}.get(itemsize, 8)
    total_bytes = total * itemsize

    gen = _tpu_generation()
    if target_block_bytes is None:
        if gen is not None and gen >= 7:
            target_block_bytes = 6 * 1024 * 1024   # v7x: faster HBM, fewer steps
        elif gen == 6:
            target_block_bytes = 4 * 1024 * 1024   # v6e: free headroom
        else:
            target_block_bytes = 2 * 1024 * 1024   # v5e / unknown: 16 MiB scoped
    # Explicit VMEM headroom for the larger blocks on v6e/v7x.
    vmem_limit = 32 * 1024 * 1024 if (gen is not None and gen >= 6) else None

    if total % 128 == 0:
        # ---- Aligned path: lane-dense (rows, lane) view. ----
        lane = None
        fallback = None
        for cand in (2048, 1024, 512, 256, 128):
            if total % cand == 0:
                if fallback is None:
                    fallback = cand
                if total // cand >= 8:
                    lane = cand
                    break
        if lane is None:
            lane = fallback
        rows = total // lane
        row_bytes = lane * itemsize

        tr_target = max(pack, (target_block_bytes // row_bytes // pack) * pack)
        # v7x has 2 TensorCores: never leave one idle on tensors > a couple MiB.
        force_split = (gen is not None and gen >= 7
                       and total_bytes >= 2 * 1024 * 1024
                       and rows >= 2 * pack)
        if force_split:
            tr_target = min(tr_target, max(pack, (rows // 2 // pack) * pack))
        tr = _choose_row_tile(rows, pack, tr_target,
                              prefer_even_blocks=(gen is not None and gen >= 7))

        view = x.reshape(rows, lane)
        block = (tr, lane)
        grid = (pl.cdiv(rows, tr),)        # ragged last block (if any) is masked
        index_map = lambda i: (i, 0)
    else:
        # ---- Unaligned path (rare for NN activations): (1, total) view. ----
        # No jnp.pad / output slice -> no extra HBM passes.  A (1, chunk) tile
        # occupies chunk/128 sublane-padded (pack, 128) VMEM tiles, so size the
        # chunk by its padded footprint (pack * itemsize bytes per element).
        chunk = max(128, (target_block_bytes // (pack * itemsize) // 128) * 128)
        if chunk >= total:
            chunk = total                  # single full-array block (always legal)
        view = x.reshape(1, total)
        block = (1, chunk)
        grid = (pl.cdiv(total, chunk),)    # ragged last block: stores are masked
        index_map = lambda i: (0, i)

    out = pl.pallas_call(
        _squared_relu_kernel,
        out_shape=jax.ShapeDtypeStruct(view.shape, dtype),
        grid_spec=pltpu.PrefetchScalarGridSpec(
            num_scalar_prefetch=0,
            grid=grid,
            in_specs=[pl.BlockSpec(block, index_map)],
            out_specs=pl.BlockSpec(block, index_map),
        ),
        compiler_params=pltpu.CompilerParams(
            # NOTE: on v7x, verify in a trace that "parallel" shards this axis
            # across both TensorCores; if not, switch to pltpu.CORE_PARALLEL.
            dimension_semantics=("parallel",),
            vmem_limit_bytes=vmem_limit,
        ),
        # Accurate mem-bound cost hint for XLA's scheduler (1 read + 1 write).
        cost_estimate=pl.CostEstimate(
            flops=2 * total, transcendentals=0, bytes_accessed=2 * total_bytes),
        # Elementwise op can run in place when the caller donates x.
        input_output_aliases=({0: 0} if donate_input else {}),
    )(view)

    return out.reshape(orig_shape)


if __name__ == "__main__":
    key = jax.random.PRNGKey(0)

    # NCHW-style input consistent with typical usage of the module.
    x = jax.random.normal(key, (2, 4, 16, 16), dtype=jnp.float32)
    y = jax.block_until_ready(squared_relu(x))
    y_ref = jnp.maximum(x, 0.0) ** 2
    assert y.shape == x.shape and y.dtype == x.dtype
    assert jnp.allclose(y, y_ref, atol=1e-6, rtol=1e-6)

    # Robustness: bf16 input (aligned path, different sublane packing).
    xb = jax.random.normal(jax.random.PRNGKey(1), (4, 8, 128), dtype=jnp.bfloat16)
    yb = jax.block_until_ready(squared_relu(xb))
    rb = jnp.maximum(xb, 0)
    assert yb.dtype == xb.dtype
    assert jnp.allclose(yb.astype(jnp.float32), (rb * rb).astype(jnp.float32),
                        atol=1e-2, rtol=1e-2)

    # Robustness: element count not a multiple of 128 (unaligned path, no pad).
    xr = jax.random.normal(jax.random.PRNGKey(2), (3, 5, 7), dtype=jnp.float32)
    yr = jax.block_until_ready(squared_relu(xr))
    yr_ref = jnp.maximum(xr, 0.0) ** 2
    assert yr.shape == xr.shape and jnp.allclose(yr, yr_ref, atol=1e-6, rtol=1e-6)

    print("KERNEL_OK")
</pallas_src>

<mosaic_0001>
module attributes {stable_mosaic.version = 11 : i64} {
  func.func @_squared_relu_kernel(%arg0: i32, %arg1: memref<8x256xf32, #tpu.memory_space<vmem>>, %arg2: memref<8x256xf32, #tpu.memory_space<vmem>>) attributes {dimension_semantics = [#tpu.dimension_semantics<parallel>], iteration_bounds = array<i64: 1>, scalar_prefetch = 0 : i64, scratch_operands = 0 : i64, tpu.core_type = #tpu.core_type<tc>, window_params = [{transform_indices = @transform_0, window_bounds = array<i64: 8, 256>}, {transform_indices = @transform_1, window_bounds = array<i64: 8, 256>}]} {
    %c0 = arith.constant 0 : index
    %c0_0 = arith.constant 0 : index
    %0 = vector.load %arg1[%c0, %c0_0] : memref<8x256xf32, #tpu.memory_space<vmem>>, vector<8x256xf32>
    %cst = arith.constant 0.000000e+00 : f32
    %1 = vector.broadcast %cst : f32 to vector<8x256xf32>
    %2 = arith.maximumf %0, %1 : vector<8x256xf32>
    %3 = arith.mulf %2, %2 : vector<8x256xf32>
    %c0_1 = arith.constant 0 : index
    %c0_2 = arith.constant 0 : index
    %4 = vector.load %arg2[%c0_1, %c0_2] : memref<8x256xf32, #tpu.memory_space<vmem>>, vector<8x256xf32>
    tpu.vector_store %arg2[%c0_1, %c0_2], %3 {strides = array<i32>} : memref<8x256xf32, #tpu.memory_space<vmem>>, vector<8x256xf32>,
    return
  }
  func.func @transform_0(%arg0: i32) -> (i32, i32) {
    %c0_i32 = arith.constant 0 : i32
    %c0_i32_0 = arith.constant 0 : i32
    return %arg0, %c0_i32 : i32, i32
  }
  func.func @transform_1(%arg0: i32) -> (i32, i32) {
    %c0_i32 = arith.constant 0 : i32
    %c0_i32_0 = arith.constant 0 : i32
    return %arg0, %c0_i32 : i32, i32
  }
}

</mosaic_0001>

<bundles_post_ra>
// kernel: tpu_custom_call.1
= control target key start
LH: loop header
LB: loop body
LE: loop exit
PB: predicated region body
PF: predicated region fallthrough
CT: control target
= control target key end

     0   :  { %6 = vsyncpa [#allocation3], 0  ;;  %s108_s0 = inlined_call_operand.hbm [shape: f32[8,256], index: 0, kind: input, shape index: {}]   ;;  %s109_s1 = inlined_call_operand.hbm [shape: f32[8,256], index: 1, kind: output, shape index: {}]  }
   0x1   :  { %7 = vsyncpa [#allocation4], 0  ;;  %s90_s6 = smov [#allocation2]  }
   0x2   :  { %s14_s7 = sshll.u32 %s90_s6, 4  ;;  %s15_s7 = int_to_ptr.vmem [resolvable:$true] %s14_s7 }
   0x3   :  { %s54_s8 = scalar_lea.vmem %s15_s7, 256  ;;  %p59_p1 = scmp.lt.s32.totalorder %s15_s7, %s15_s7 }
   0x4   :  { %p55_p0 = scmp.ne.s32.totalorder %s15_s7, %s54_s8  ;;  %p60_p2 = scmp.lt.s32.totalorder %s54_s8, %s54_s8 }
   0x6   :  { %p61_p3 = por %p60_p2, %p59_p1 }
   0x8   :  { %p62_p4 = pnand %p61_p3, %p55_p0 }
   0xa   :  { %65 = shalt.err (!%p62_p4)
}
   0xb   :  { %17 = dma.hbm_to_vmem [thread:$0]  %s108_s0, 256, %s15_s7, [#allocation3]  }
   0xc   :  { %86 = dma.done.wait [#allocation3], 256  }
   0xd   :  { %87 = vsyncadd [#allocation3], 4294967040  ;;  %v21_v0 = vld [vmem:[#allocation2] sm:$0xff]  ;;  %v22_v1 = vld [vmem:[#allocation2 + $0x8] sm:$0xff]  ;;  %s91_s11 = smov [#allocation5]  }
   0xe   :  { %s35_s12 = sshll.u32 %s91_s11, 4  ;;  %v23_v2 = vmax.f32 %v21_v0, 0.0  ;;  %v24_v3 = vmax.f32 %v22_v1, 0.0  ;;  %s36_s12 = int_to_ptr.vmem [resolvable:$true] %s35_s12 }
   0xf   :  { %s66_s13 = scalar_lea.vmem %s36_s12, 256  ;;  %p71_p6 = scmp.lt.s32.totalorder %s36_s12, %s36_s12 }
  0x10   :  { %v25_v4 = vmul.f32 %v23_v2, %v23_v2  ;;  %v26_v5 = vmul.f32 %v24_v3, %v24_v3  ;;  %p67_p5 = scmp.ne.s32.totalorder %s36_s12, %s66_s13  ;;  %p72_p7 = scmp.lt.s32.totalorder %s66_s13, %s66_s13 }
  0x12   :  { %27 = vst [vmem:[#allocation5] sm:$0xff] %v25_v4  ;;  %28 = vst [vmem:[#allocation5 + $0x8] sm:$0xff] %v26_v5  ;;  %p73_p8 = por %p72_p7, %p71_p6 }
  0x14   :  { %p74_p9 = pnand %p73_p8, %p67_p5 }
  0x16   :  { %77 = shalt.err (!%p74_p9)
}
  0x17   :  { %38 = dma.vmem_to_hbm [thread:$0]  %s36_s12, 256, %s109_s1, [#allocation4]  }
  0x18   :  { %88 = dma.done.wait [#allocation4], 256  }
  0x19   :  { %89 = vsyncadd [#allocation4], 4294967040 }
  0x1a   :  { %42 = vsyncpa [#allocation3], 1 }
  0x1b   :  { %43 = vsyncpa [#allocation4], 1 }

</bundles_post_ra>
